<compile_context>
chip_gen: v7x
topology: tpu7x:2x2x1
jax: 0.10.0
libtpu: 0.0.40
codegen_flags: <defaults>
</compile_context>

<pallas_src>
import math

import jax
import jax.numpy as jnp
from jax.experimental import pallas as pl
from jax.experimental.pallas import tpu as pltpu


# ----------------------------------------------------------------------------
# Pre-pass: sp_W^T = softplus(W).T, cast to MXU operand dtype.
# Memory-bound, runs once; the transpose (XLU) and transcendentals (EUP) are
# paid here instead of once per (i, k) matmul grid step.
# ----------------------------------------------------------------------------
def _softplus_transpose_kernel(w_ref, o_ref):
    # w_ref: (tn, tk) tile of W (N, K); o_ref: (tk, tn) tile of sp_W^T (K, N).
    w = w_ref[...].astype(jnp.float32)
    # Numerically stable softplus: max(w, 0) + log1p(exp(-|w|)).
    sp = jnp.maximum(w, 0.0) + jnp.log1p(jnp.exp(-jnp.abs(w)))
    o_ref[...] = sp.T.astype(o_ref.dtype)


# ----------------------------------------------------------------------------
# Main matmul: y = x @ sp_W^T + b, f32 VMEM accumulator, bias at finalize.
# ----------------------------------------------------------------------------
def _matmul_bias_kernel(x_ref, w_ref, b_ref, o_ref, acc_ref):
    # x_ref: (tm, tk), w_ref: (tk, tn), b_ref: (1, tn), o_ref: (tm, tn)
    k = pl.program_id(2)

    @pl.when(k == 0)
    def _():
        acc_ref[...] = jnp.zeros_like(acc_ref)

    acc_ref[...] += jnp.dot(
        x_ref[...], w_ref[...], preferred_element_type=jnp.float32
    )

    @pl.when(k == pl.num_programs(2) - 1)
    def _():
        o_ref[...] = (acc_ref[...] + b_ref[...]).astype(o_ref.dtype)


def _round_up(x, m):
    return ((x + m - 1) // m) * m


def _default_tiles():
    """(tm, tn, tk, vmem_limit_bytes) per TPU generation."""
    try:
        kind = jax.devices()[0].device_kind.lower()
    except Exception:  # pragma: no cover - defensive
        kind = ""
    if "v6" in kind:
        # HBM-bound at 512^2 on v6e (ridge ~680 fl/B); 2048x1024 ~ 683 fl/B.
        return 2048, 1024, 512, 64 * 1024 * 1024
    if "v7" in kind or "7x" in kind:
        # v7x ridge ~310 fl/B and only 64 MiB VMEM/TC: moderate tiles.
        return 1024, 512, 512, 48 * 1024 * 1024
    if "v5e" in kind or "v5 lite" in kind or "v5lite" in kind:
        # Already compute-bound at 512x512; grow K to amortize acc traffic.
        return 512, 512, 1024, 64 * 1024 * 1024
    return 1024, 512, 512, 64 * 1024 * 1024


def softplus_layer(
    x,
    weight,
    bias,
    *,
    tm=None,
    tn=None,
    tk=None,
    use_bf16_mxu=True,
    vmem_limit_bytes=None,
):
    """x: (*, in_features); weight: (out, in); bias: (out,) or None."""
    out_features, in_features = weight.shape
    lead_shape = x.shape[:-1]
    m = math.prod(lead_shape) if lead_shape else 1
    out_dtype = x.dtype

    d_tm, d_tn, d_tk, d_vmem = _default_tiles()
    tm = d_tm if tm is None else tm
    tn = d_tn if tn is None else tn
    tk = d_tk if tk is None else tk
    vmem_limit_bytes = d_vmem if vmem_limit_bytes is None else vmem_limit_bytes

    # MXU operand dtype: bf16 for f32 inputs (f32 accumulation kept).
    if use_bf16_mxu and x.dtype == jnp.float32:
        op_dtype = jnp.bfloat16
    else:
        op_dtype = x.dtype

    # Tile sizes: 128-aligned, never larger than the padded problem dims.
    tm = min(tm, _round_up(m, 128))
    tn = min(tn, _round_up(out_features, 128))
    tk = min(tk, _round_up(in_features, 128))

    m_pad = _round_up(m, tm)
    n_pad = _round_up(out_features, tn)
    k_pad = _round_up(in_features, tk)

    x2d = x.reshape(m, in_features).astype(op_dtype)
    # Zero-pad only when needed.  Padded x columns are zero, so the
    # softplus(0)=log(2) entries in padded K columns of sp_W contribute
    # nothing; padded M rows / N columns are sliced away at the end.
    if m_pad != m or k_pad != in_features:
        x_p = jnp.pad(x2d, ((0, m_pad - m), (0, k_pad - in_features)))
    else:
        x_p = x2d

    if n_pad != out_features or k_pad != in_features:
        w_p = jnp.pad(
            weight, ((0, n_pad - out_features), (0, k_pad - in_features))
        )
    else:
        w_p = weight

    if bias is None:
        b_p = jnp.zeros((1, n_pad), dtype=jnp.float32)
    else:
        b_f32 = bias.astype(jnp.float32)
        if n_pad != out_features:
            b_f32 = jnp.pad(b_f32, (0, n_pad - out_features))
        b_p = b_f32.reshape(1, n_pad)

    w_itemsize = jnp.dtype(w_p.dtype).itemsize
    op_itemsize = jnp.dtype(op_dtype).itemsize
    out_itemsize = jnp.dtype(out_dtype).itemsize

    # --- Pre-pass: sp_W^T (K, N) in op_dtype ---------------------------------
    spwt = pl.pallas_call(
        _softplus_transpose_kernel,
        out_shape=jax.ShapeDtypeStruct((k_pad, n_pad), op_dtype),
        grid_spec=pltpu.PrefetchScalarGridSpec(
            num_scalar_prefetch=0,
            grid=(n_pad // tn, k_pad // tk),
            in_specs=[pl.BlockSpec((tn, tk), lambda j, k: (j, k))],
            out_specs=pl.BlockSpec((tk, tn), lambda j, k: (k, j)),
        ),
        compiler_params=pltpu.CompilerParams(
            dimension_semantics=("parallel", "parallel"),
            vmem_limit_bytes=vmem_limit_bytes,
        ),
        cost_estimate=pl.CostEstimate(
            flops=4 * n_pad * k_pad,
            transcendentals=2 * n_pad * k_pad,
            bytes_accessed=n_pad * k_pad * (w_itemsize + op_itemsize),
        ),
    )(w_p)

    # --- Main matmul ----------------------------------------------------------
    grid = (m_pad // tm, n_pad // tn, k_pad // tk)

    out_p = pl.pallas_call(
        _matmul_bias_kernel,
        out_shape=jax.ShapeDtypeStruct((m_pad, n_pad), out_dtype),
        grid_spec=pltpu.PrefetchScalarGridSpec(
            num_scalar_prefetch=0,
            grid=grid,
            in_specs=[
                pl.BlockSpec((tm, tk), lambda i, j, k: (i, k)),  # x tile
                pl.BlockSpec((tk, tn), lambda i, j, k: (k, j)),  # sp_W^T tile
                pl.BlockSpec((1, tn), lambda i, j, k: (0, j)),   # bias tile
            ],
            out_specs=pl.BlockSpec((tm, tn), lambda i, j, k: (i, j)),
            scratch_shapes=[pltpu.VMEM((tm, tn), jnp.float32)],
        ),
        compiler_params=pltpu.CompilerParams(
            dimension_semantics=("parallel", "parallel", "arbitrary"),
            vmem_limit_bytes=vmem_limit_bytes,
        ),
        cost_estimate=pl.CostEstimate(
            flops=2 * m_pad * n_pad * k_pad,
            transcendentals=0,
            bytes_accessed=(
                m_pad * k_pad * op_itemsize
                + k_pad * n_pad * op_itemsize
                + m_pad * n_pad * out_itemsize
            ),
        ),
    )(x_p, spwt, b_p)

    out2d = out_p[:m, :out_features]
    return out2d.reshape(*lead_shape, out_features)


def init_params(key, in_features, out_features, dtype=jnp.float32):
    # Mirrors nn.Linear-style init: kaiming_uniform_(a=sqrt(5)) ->
    # U(-1/sqrt(fan_in), 1/sqrt(fan_in)) for both weight and bias.
    kw, kb = jax.random.split(key)
    bound = 1.0 / math.sqrt(in_features)
    weight = jax.random.uniform(
        kw, (out_features, in_features), dtype=dtype, minval=-bound, maxval=bound
    )
    bias = jax.random.uniform(
        kb, (out_features,), dtype=dtype, minval=-bound, maxval=bound
    )
    return weight, bias


if __name__ == "__main__":
    key = jax.random.PRNGKey(0)
    k_x, k_p = jax.random.split(key)

    batch, seq, in_features, out_features = 2, 8, 32, 16
    x = jax.random.normal(k_x, (batch, seq, in_features), dtype=jnp.float32)
    weight, bias = init_params(k_p, in_features, out_features)

    # Reference in plain JAX.
    sp_w = jax.nn.softplus(weight)
    y_ref = x @ sp_w.T + bias

    # Fast path: bf16 MXU operands, f32 accumulation (looser tolerance).
    y_fast = jax.block_until_ready(softplus_layer(x, weight, bias))
    assert y_fast.shape == (batch, seq, out_features)
    assert jnp.allclose(y_fast, y_ref, atol=5e-2, rtol=5e-2)

    # Exact-f32 path: tight tolerance vs reference.
    y_f32 = jax.block_until_ready(
        softplus_layer(x, weight, bias, use_bf16_mxu=False)
    )
    assert jnp.allclose(y_f32, y_ref, atol=1e-5, rtol=1e-5)

    print("KERNEL_OK")
</pallas_src>

<mosaic_0001>
module attributes {stable_mosaic.version = 11 : i64} {
  func.func @_softplus_transpose_kernel(%arg0: i32, %arg1: i32, %arg2: memref<128x128xf32, #tpu.memory_space<vmem>>, %arg3: memref<128x128xbf16, #tpu.memory_space<vmem>>) attributes {dimension_semantics = [#tpu.dimension_semantics<parallel>, #tpu.dimension_semantics<parallel>], iteration_bounds = array<i64: 1, 1>, scalar_prefetch = 0 : i64, scratch_operands = 0 : i64, tpu.core_type = #tpu.core_type<tc>, window_params = [{transform_indices = @transform_0, window_bounds = array<i64: 128, 128>}, {transform_indices = @transform_1, window_bounds = array<i64: 128, 128>}]} {
    %c0 = arith.constant 0 : index
    %c0_0 = arith.constant 0 : index
    %0 = vector.load %arg2[%c0, %c0_0] : memref<128x128xf32, #tpu.memory_space<vmem>>, vector<128x128xf32>
    %cst = arith.constant 0.000000e+00 : f32
    %1 = vector.broadcast %cst : f32 to vector<128x128xf32>
    %2 = arith.maximumf %0, %1 : vector<128x128xf32>
    %3 = math.absf %0 : vector<128x128xf32>
    %cst_1 = arith.constant 0.000000e+00 : f32
    %4 = vector.broadcast %cst_1 : f32 to vector<128x128xf32>
    %5 = arith.subf %4, %3 : vector<128x128xf32>
    %6 = math.exp %5 : vector<128x128xf32>
    %7 = math.log1p %6 : vector<128x128xf32>
    %8 = arith.addf %2, %7 : vector<128x128xf32>
    %9 = tpu.transpose %8, [1, 0] : vector<128x128xf32> -> vector<128x128xf32>
    %10 = arith.truncf %9 : vector<128x128xf32> to vector<128x128xbf16>
    %c0_2 = arith.constant 0 : index
    %c0_3 = arith.constant 0 : index
    %11 = vector.load %arg3[%c0_2, %c0_3] : memref<128x128xbf16, #tpu.memory_space<vmem>>, vector<128x128xbf16>
    tpu.vector_store %arg3[%c0_2, %c0_3], %10 {strides = array<i32>} : memref<128x128xbf16, #tpu.memory_space<vmem>>, vector<128x128xbf16>,
    return
  }
  func.func @transform_0(%arg0: i32, %arg1: i32) -> (i32, i32) {
    %c0_i32 = arith.constant 0 : i32
    return %arg0, %arg1 : i32, i32
  }
  func.func @transform_1(%arg0: i32, %arg1: i32) -> (i32, i32) {
    %c0_i32 = arith.constant 0 : i32
    return %arg1, %arg0 : i32, i32
  }
}

</mosaic_0001>

<bundles_post_ra>
// kernel: tpu_custom_call.1
= control target key start
LH: loop header
LB: loop body
LE: loop exit
PB: predicated region body
PF: predicated region fallthrough
CT: control target
= control target key end

     0   :  { %6 = vsyncpa [#allocation3], 0  ;;  %s847_s0 = inlined_call_operand.hbm [shape: f32[128,128], index: 0, kind: input, shape index: {}]   ;;  %s848_s1 = inlined_call_operand.hbm [shape: bf16[128,128], index: 1, kind: output, shape index: {}]  }
   0x1   :  { %7 = vsyncpa [#allocation4], 0  ;;  %s605_s6 = smov [#allocation2]   ;;  %s557_s10 = scalar_lea.hbm %s847_s0, 2048 }
   0x2   :  { %s13_s7 = sshll.u32 %s605_s6, 4  ;;  %p558_p0 = scmp.ne.s32.totalorder %s847_s0, %s557_s10  ;;  %s14_s7 = int_to_ptr.vmem [resolvable:$true] %s13_s7 }
   0x3   :  { %p561_p1 = scmp.lt.u32.totalorder %s557_s10, %s847_s0 }
   0x5   :  { %p563_p2 = pnand %p561_p1, %p558_p0 }
   0x7   :  { %566 = shalt.err (!%p563_p2)
}
   0x8   :  { %s567_s15 = scalar_lea.vmem %s14_s7, 2048  ;;  %p572_p4 = scmp.lt.s32.totalorder %s14_s7, %s14_s7 }
   0x9   :  { %p568_p3 = scmp.ne.s32.totalorder %s14_s7, %s567_s15  ;;  %p573_p5 = scmp.lt.s32.totalorder %s567_s15, %s567_s15 }
   0xb   :  { %p574_p6 = por %p573_p5, %p572_p4 }
   0xd   :  { %p575_p7 = pnand %p574_p6, %p568_p3 }
   0xf   :  { %578 = shalt.err (!%p575_p7)
}
  0x10   :  { %s606_s16 = smov 128   ;;  %s607_s17 = smov 8  }
  0x11   :  { %19 = dma.hbm_to_vmem [thread:$0]  %s847_s0, 2048, %s14_s7, [#allocation3], %s606_s16, %s606_s16, %s607_s17  }
  0x12   :  { %601 = dma.done.wait [#allocation3], 2048  }
  0x13   :  { %602 = vsyncadd [#allocation3], 4294965248  ;;  %v633_v0 = vld [vmem:[#allocation2] sm:$0xff]  ;;  %v635_v1 = vld [vmem:[#allocation2 + $0x8] sm:$0xff]  ;;  %s608_s0 = smov [#allocation5]  }
  0x14   :  { %v637_v2 = vld [vmem:[#allocation2 + $0x10] sm:$0xff]  ;;  %v55_v3 = vand.u32 2147483647, %v633_v0  ;;  %v56_v4 = vand.u32 2147483647, %v635_v1  ;;  %v642_v6 = vld [vmem:[#allocation2 + $0x18] sm:$0xff] }
  0x15   :  { %v57_v5 = vand.u32 2147483647, %v637_v2  ;;  %v644_v7 = vld [vmem:[#allocation2 + $0x20] sm:$0xff]  ;;  %v58_v10 = vand.u32 2147483647, %v642_v6  ;;  %v647_v11 = vld [vmem:[#allocation2 + $0x28] sm:$0xff] }
  0x16   :  { %v71_v8 = vsub.f32 0.0, %v55_v3  ;;  %v72_v9 = vsub.f32 0.0, %v56_v4  ;;  %v59_v13 = vand.u32 2147483647, %v644_v7  ;;  %v650_v14 = vld [vmem:[#allocation2 + $0x30] sm:$0xff]  ;;  %v654_v25 = vld [vmem:[#allocation2 + $0x38] sm:$0xff] }
  0x17   :  { %v73_v12 = vsub.f32 0.0, %v57_v5  ;;  %v74_v17 = vsub.f32 0.0, %v58_v10  ;;  %v60_v20 = vand.u32 2147483647, %v647_v11  ;;  %v61_v22 = vand.u32 2147483647, %v650_v14 }
  0x18   :  { %v87_v15 = vmul.f32 1.442695, %v71_v8  ;;  %v89_v16 = vmul.f32 1.442695, %v72_v9  ;;  %v75_v19 = vsub.f32 0.0, %v59_v13  ;;  %v657_v29 = vld [vmem:[#allocation2 + $0x40] sm:$0xff] }
  0x19   :  { %v91_v18 = vmul.f32 1.442695, %v73_v12  ;;  %v93_v21 = vmul.f32 1.442695, %v74_v17  ;;  %v76_v24 = vsub.f32 0.0, %v60_v20  ;;  %v77_v27 = vsub.f32 0.0, %v61_v22 }
  0x1a   :  { %493 = vpow2.f32 %v87_v15  ;;  %v95_v23 = vmul.f32 1.442695, %v75_v19  ;;  %v62_v28 = vand.u32 2147483647, %v654_v25  ;;  %v63_v30 = vand.u32 2147483647, %v657_v29 }
  0x1b   :  { %495 = vpow2.f32 %v89_v16  ;;  %v97_v26 = vmul.f32 1.442695, %v76_v24  ;;  %v99_v31 = vmul.f32 1.442695, %v77_v27  ;;  %v660_v33 = vld [vmem:[#allocation2 + $0x48] sm:$0xff]  ;;  %v662_v38 = vld [vmem:[#allocation2 + $0x50] sm:$0xff] }
  0x1c   :  { %497 = vpow2.f32 %v91_v18  ;;  %v78_v32 = vsub.f32 0.0, %v62_v28  ;;  %v79_v37 = vsub.f32 0.0, %v63_v30  ;;  %v64_v42 = vand.u32 2147483647, %v660_v33  ;;  %v674_v51 = vld [vmem:[#allocation2 + $0x58] sm:$0xff]  ;;  %s396_s20 = sshll.u32 %s608_s0, 4  ;;  %s397_s20 = int_to_ptr.vmem [resolvable:$true] %s396_s20 }
  0x1d   :  { %499 = vpow2.f32 %v93_v21  ;;  %v65_v47 = vand.u32 2147483647, %v662_v38  ;;  %v66_v57 = vand.u32 2147483647, %v674_v51  ;;  %v39_v63 = vmax.f32 %v633_v0, 0.0  ;;  %v751_v19 = vld [vmem:[#allocation2 + $0x78] sm:$0xff]  ;;  %p584_p9 = scmp.lt.s32.totalorder %s397_s20, %s397_s20 }
  0x1e   :  { %501 = vpow2.f32 %v95_v23  ;;  %v101_v41 = vmul.f32 1.442695, %v78_v32  ;;  %v103_v50 = vmul.f32 1.442695, %v79_v37  ;;  %v80_v52 = vsub.f32 0.0, %v64_v42  ;;  %v704_v32 = vld [vmem:[#allocation2 + $0x60] sm:$0xff] }
  0x1f   :  { %503 = vpow2.f32 %v97_v26  ;;  %v81_v60 = vsub.f32 0.0, %v65_v47  ;;  %v40_v3 = vmax.f32 %v635_v1, 0.0  ;;  %v82_v12 = vsub.f32 0.0, %v66_v57  ;;  %s579_s21 = scalar_lea.vmem %s397_s20, 1024 }
  0x20   :  { %505 = vpow2.f32 %v99_v31  ;;  %v105_v62 = vmul.f32 1.442695, %v80_v52  ;;  %v41_v23 = vmax.f32 %v637_v2, 0.0  ;;  %v67_v47 = vand.u32 2147483647, %v704_v32  ;;  %p580_p8 = scmp.ne.s32.totalorder %s397_s20, %s579_s21  ;;  %p585_p10 = scmp.lt.s32.totalorder %s579_s21, %s579_s21 }
  0x21   :  { %v107_v0 = vmul.f32 1.442695, %v81_v60  ;;  %v109_v42 = vmul.f32 1.442695, %v82_v12  ;;  %v43_v15 = vmax.f32 %v644_v7, 0.0 }
  0x22   :  { %p586_p11 = por %p585_p10, %p584_p9 }
  0x24   :  { %v494_v34 = vpop.eup %493  ;;  %p587_p12 = pnand %p586_p11, %p580_p8 }
  0x25   :  { %v496_v35 = vpop.eup %495  ;;  %v119_v36 = vadd.f32 1.0, %v494_v34  ;;  %v122_v46 = vmul.f32 -0.5, %v494_v34  ;;  %v125_v58 = vand.u32 2147483647, %v494_v34 }
  0x26   :  { %v664_v39 = vpop.eup %497  ;;  %v128_v40 = vadd.f32 1.0, %v496_v35  ;;  %v131_v48 = vmul.f32 -0.5, %v496_v35  ;;  %v134_v61 = vand.u32 2147483647, %v496_v35 }
  0x27   :  { %v667_v43 = vpop.eup %499  ;;  %507 = vlog2.f32 %v119_v36  ;;  %v137_v44 = vadd.f32 1.0, %v664_v39  ;;  %v123_v55 = vadd.f32 1.0, %v122_v46  ;;  %v140_v56 = vmul.f32 -0.5, %v664_v39 }
  0x28   :  { %v670_v45 = vpop.eup %501  ;;  %509 = vlog2.f32 %v128_v40  ;;  %v146_v49 = vadd.f32 1.0, %v667_v43  ;;  %v132_v59 = vadd.f32 1.0, %v131_v48  ;;  %v149_v10 = vmul.f32 -0.5, %v667_v43  ;;  %v718_v48 = vld [vmem:[#allocation2 + $0x68] sm:$0xff] }
  0x29   :  { %511 = vlog2.f32 %v137_v44  ;;  %v155_v53 = vadd.f32 1.0, %v670_v45  ;;  %v677_v54 = vpop.eup %503  ;;  %v124_v8 = vmul.f32 %v494_v34, %v123_v55  ;;  %v141_v9 = vadd.f32 1.0, %v140_v56 }
  0x2a   :  { %513 = vpow2.f32 %v101_v41  ;;  %v164_v4 = vadd.f32 1.0, %v677_v54  ;;  %v684_v5 = vpop.eup %505  ;;  %vm687_vm0 = vcmp.lt.f32.partialorder %v125_v58, 0.0004427343  ;;  %v133_v16 = vmul.f32 %v496_v35, %v132_v59  ;;  %v730_v59 = vld [vmem:[#allocation2 + $0x70] sm:$0xff] }
  0x2b   :  { %515 = vlog2.f32 %v146_v49  ;;  %v143_v17 = vand.u32 2147483647, %v664_v39  ;;  %vm692_vm1 = vcmp.lt.f32.partialorder %v134_v61, 0.0004427343  ;;  %v158_v20 = vmul.f32 -0.5, %v670_v45 }
  0x2c   :  { %517 = vpow2.f32 %v103_v50  ;;  %v173_v24 = vadd.f32 1.0, %v684_v5  ;;  %v142_v30 = vmul.f32 %v664_v39, %v141_v9  ;;  %v150_v31 = vadd.f32 1.0, %v149_v10 }
  0x2d   :  { %519 = vlog2.f32 %v155_v53  ;;  %vm708_vm2 = vcmp.lt.f32.partialorder %v143_v17, 0.0004427343  ;;  %v152_v37 = vand.u32 2147483647, %v667_v43  ;;  %v159_v40 = vadd.f32 1.0, %v158_v20 }
  0x2e   :  { %521 = vpow2.f32 %v105_v62  ;;  %v167_v41 = vmul.f32 -0.5, %v677_v54  ;;  %v151_v53 = vmul.f32 %v667_v43, %v150_v31  ;;  %v161_v55 = vand.u32 2147483647, %v670_v45 }
  0x2f   :  { %523 = vlog2.f32 %v164_v4  ;;  %v42_v56 = vmax.f32 %v642_v6, 0.0  ;;  %vm725_vm3 = vcmp.lt.f32.partialorder %v152_v37, 0.0004427343  ;;  %v176_v58 = vmul.f32 -0.5, %v684_v5 }
  0x30   :  { %525 = vpow2.f32 %v107_v0  ;;  %v160_v60 = vmul.f32 %v670_v45, %v159_v40  ;;  %v168_v61 = vadd.f32 1.0, %v167_v41  ;;  %v68_v62 = vand.u32 2147483647, %v718_v48 }
  0x31   :  { %v508_v13 = vpop.eup %507  ;;  %527 = vlog2.f32 %v173_v24  ;;  %vm739_vm4 = vcmp.lt.f32.partialorder %v161_v55, 0.0004427343  ;;  %v83_v45 = vsub.f32 0.0, %v67_v47  ;;  %v69_v9 = vand.u32 2147483647, %v730_v59 }
  0x32   :  { %v510_v18 = vpop.eup %509  ;;  %v121_v1 = vmul.f32 0.6931472, %v508_v13  ;;  %529 = vpow2.f32 %v109_v42  ;;  %v170_v12 = vand.u32 2147483647, %v677_v54  ;;  %v177_v13 = vadd.f32 1.0, %v176_v58 }
  0x33   :  { %v512_v21 = vpop.eup %511  ;;  %v130_v22 = vmul.f32 0.6931472, %v510_v18  ;;  %v85_v7 = vsub.f32 0.0, %v69_v9 }
  0x34   :  { %v699_v26 = vpop.eup %513  ;;  %v127_v27 = vsel %vm687_vm0, %v124_v8, %v121_v1  ;;  %v139_v28 = vmul.f32 0.6931472, %v512_v21  ;;  %vm756_vm5 = vcmp.lt.f32.partialorder %v170_v12, 0.0004427343 }
  0x35   :  { %v516_v34 = vpop.eup %515  ;;  %v263_v35 = vadd.f32 %v127_v27, %v39_v63  ;;  %v136_v36 = vsel %vm692_vm1, %v133_v16, %v130_v22  ;;  %v182_v46 = vadd.f32 1.0, %v699_v26  ;;  %v169_v16 = vmul.f32 %v677_v54, %v168_v61 }
  0x36   :  { %v714_v39 = vpop.eup %517  ;;  %v264_v44 = vadd.f32 %v136_v36, %v40_v3  ;;  %v145_v50 = vsel %vm708_vm2, %v142_v30, %v139_v28  ;;  %v148_v52 = vmul.f32 0.6931472, %v516_v34  ;;  %v185_v17 = vmul.f32 -0.5, %v699_v26 }
  0x37   :  { %279 = vxpose.xlu0.b32.start [1/16] %v263_v35, 128  ;;  %v520_v49 = vpop.eup %519  ;;  %v265_v43 = vadd.f32 %v145_v50, %v41_v23  ;;  %531 = vlog2.f32 %v182_v46  ;;  %v191_v6 = vadd.f32 1.0, %v714_v39  ;;  %v111_v22 = vmul.f32 1.442695, %v83_v45 }
  0x38   :  { %v157_v63 = vmul.f32 0.6931472, %v520_v49  ;;  %v735_v3 = vpop.eup %521  ;;  %v154_v4 = vsel %vm725_vm3, %v151_v53, %v148_v52  ;;  %v84_v23 = vsub.f32 0.0, %v68_v62  ;;  %v44_v54 = vmax.f32 %v647_v11, 0.0 }
  0x39   :  { %v524_v10 = vpop.eup %523  ;;  %v266_v0 = vadd.f32 %v154_v4, %v42_v56  ;;  %533 = vlog2.f32 %v191_v6  ;;  %v200_v1 = vadd.f32 1.0, %v735_v3  ;;  %v178_v28 = vmul.f32 %v684_v5, %v177_v13 }
  0x3a   :  { %v163_v18 = vsel %vm739_vm4, %v160_v60, %v157_v63  ;;  %v753_v20 = vpop.eup %525  ;;  %v166_v21 = vmul.f32 0.6931472, %v524_v10  ;;  %v179_v30 = vand.u32 2147483647, %v684_v5  ;;  %v194_v31 = vmul.f32 -0.5, %v714_v39 }
  0x3b   :  { %280 = vxpose.xlu0.b32.cont [2/16] %v264_v44, 128  ;;  %v528_v24 = vpop.eup %527  ;;  %535 = vpow2.f32 %v111_v22  ;;  %v113_v34 = vmul.f32 1.442695, %v84_v23  ;;  %v115_v35 = vmul.f32 1.442695, %v85_v7  ;;  %v267_v36 = vadd.f32 %v163_v18, %v43_v15 }
  0x3c   :  { %537 = vlog2.f32 %v200_v1  ;;  %v209_v2 = vadd.f32 1.0, %v753_v20  ;;  %v70_v11 = vand.u32 2147483647, %v751_v19  ;;  %v765_v37 = vpop.eup %529  ;;  %v172_v40 = vsel %vm756_vm5, %v169_v16, %v166_v21 }
  0x3d   :  { %v175_v41 = vmul.f32 0.6931472, %v528_v24  ;;  %v186_v42 = vadd.f32 1.0, %v185_v17  ;;  %539 = vpow2.f32 %v113_v34  ;;  %vm769_vm6 = vcmp.lt.f32.partialorder %v179_v30, 0.0004427343 }
  0x3e   :  { %v188_v46 = vand.u32 2147483647, %v699_v26  ;;  %v86_v47 = vsub.f32 0.0, %v70_v11  ;;  %v45_v49 = vmax.f32 %v650_v14, 0.0  ;;  %v195_v50 = vadd.f32 1.0, %v194_v31 }
  0x3f   :  { %281 = vxpose.xlu0.b32.cont [3/16] %v265_v43, 128  ;;  %541 = vpow2.f32 %v115_v35  ;;  %v268_v52 = vadd.f32 %v172_v40, %v44_v54  ;;  %v218_v53 = vadd.f32 1.0, %v765_v37  ;;  %v181_v56 = vsel %vm769_vm6, %v178_v28, %v175_v41 }
  0x40   :  { %543 = vlog2.f32 %v209_v2  ;;  %v117_v55 = vmul.f32 1.442695, %v86_v47  ;;  %v187_v58 = vmul.f32 %v699_v26, %v186_v42  ;;  %v203_v60 = vmul.f32 -0.5, %v735_v3 }
  0x41   :  { %v532_v5 = vpop.eup %531  ;;  %vm780_vm7 = vcmp.lt.f32.partialorder %v188_v46, 0.0004427343  ;;  %v197_v14 = vand.u32 2147483647, %v714_v39  ;;  %v269_v43 = vadd.f32 %v181_v56, %v45_v49  ;;  %v46_v63 = vmax.f32 %v654_v25, 0.0 }
  0x42   :  { %v184_v57 = vmul.f32 0.6931472, %v532_v5  ;;  %545 = vpow2.f32 %v117_v55  ;;  %v196_v6 = vmul.f32 %v714_v39, %v195_v50  ;;  %v204_v45 = vadd.f32 1.0, %v203_v60 }
  0x43   :  { %282 = vxpose.xlu0.b32.cont [4/16] %v266_v0, 128  ;;  %v534_v61 = vpop.eup %533  ;;  %547 = vlog2.f32 %v218_v53  ;;  %v212_v9 = vmul.f32 -0.5, %v753_v20  ;;  %vm790_vm8 = vcmp.lt.f32.partialorder %v197_v14, 0.0004427343  ;;  %v206_v13 = vand.u32 2147483647, %v735_v3 }
  0x44   :  { %v190_v26 = vsel %vm780_vm7, %v187_v58, %v184_v57  ;;  %v193_v8 = vmul.f32 0.6931472, %v534_v61  ;;  %v47_v39 = vmax.f32 %v657_v29, 0.0  ;;  %v221_v17 = vmul.f32 -0.5, %v765_v37 }
  0x45   :  { %v536_v4 = vpop.eup %535  ;;  %v270_v16 = vadd.f32 %v190_v26, %v46_v63  ;;  %v205_v22 = vmul.f32 %v735_v3, %v204_v45  ;;  %v213_v23 = vadd.f32 1.0, %v212_v9  ;;  %vm805_vm9 = vcmp.lt.f32.partialorder %v206_v13, 0.0004427343 }
  0x46   :  { %v538_v10 = vpop.eup %537  ;;  %v227_v15 = vadd.f32 1.0, %v536_v4  ;;  %v199_v1 = vsel %vm790_vm8, %v196_v6, %v193_v8  ;;  %v215_v29 = vand.u32 2147483647, %v753_v20  ;;  %v48_v54 = vmax.f32 %v660_v33, 0.0 }
  0x47   :  { %283 = vxpose.xlu0.b32.cont [5/16] %v267_v36, 128  ;;  %v795_v25 = vpop.eup %539  ;;  %v202_v21 = vmul.f32 0.6931472, %v538_v10  ;;  %v271_v27 = vadd.f32 %v199_v1, %v47_v39  ;;  %v222_v28 = vadd.f32 1.0, %v221_v17  ;;  %v214_v35 = vmul.f32 %v753_v20, %v213_v23 }
  0x48   :  { %549 = vlog2.f32 %v227_v15  ;;  %v236_v0 = vadd.f32 1.0, %v795_v25  ;;  %v230_v36 = vmul.f32 -0.5, %v536_v4  ;;  %vm815_vm10 = vcmp.lt.f32.partialorder %v215_v29, 0.0004427343 }
  0x49   :  { %v800_v18 = vpop.eup %541  ;;  %v208_v3 = vsel %vm805_vm9, %v205_v22, %v202_v21  ;;  %v224_v33 = vand.u32 2147483647, %v765_v37  ;;  %v49_v40 = vmax.f32 %v662_v38, 0.0  ;;  %v223_v42 = vmul.f32 %v765_v37, %v222_v28 }
  0x4a   :  { %v544_v7 = vpop.eup %543  ;;  %551 = vlog2.f32 %v236_v0  ;;  %v245_v30 = vadd.f32 1.0, %v800_v18  ;;  %v272_v41 = vadd.f32 %v208_v3, %v48_v54  ;;  %v231_v46 = vadd.f32 1.0, %v230_v36 }
  0x4b   :  { %284 = vxpose.xlu0.b32.cont [6/16] %v268_v52, 128  ;;  %v211_v34 = vmul.f32 0.6931472, %v544_v7  ;;  %v239_v47 = vmul.f32 -0.5, %v795_v25  ;;  %vm225_vm11 = vcmp.lt.f32.partialorder %v224_v33, 0.0004427343  ;;  %v50_v38 = vmax.f32 %v674_v51, 0.0 }
  0x4c   :  { %v546_v31 = vpop.eup %545  ;;  %553 = vlog2.f32 %v245_v30  ;;  %v233_v50 = vand.u32 2147483647, %v536_v4  ;;  %v248_v53 = vmul.f32 -0.5, %v800_v18  ;;  %v232_v56 = vmul.f32 %v536_v4, %v231_v46 }
  0x4d   :  { %v548_v2 = vpop.eup %547  ;;  %v254_v5 = vadd.f32 1.0, %v546_v31  ;;  %v217_v44 = vsel %vm815_vm10, %v214_v35, %v211_v34  ;;  %v240_v57 = vadd.f32 1.0, %v239_v47  ;;  %v242_v60 = vand.u32 2147483647, %v795_v25 }
  0x4e   :  { %v220_v20 = vmul.f32 0.6931472, %v548_v2  ;;  %v273_v52 = vadd.f32 %v217_v44, %v49_v40  ;;  %vm234_vm12 = vcmp.lt.f32.partialorder %v233_v50, 0.0004427343  ;;  %v51_v62 = vmax.f32 %v704_v32, 0.0 }
  0x4f   :  { %285 = vxpose.xlu0.b32.cont [7/16] %v269_v43, 128  ;;  %555 = vlog2.f32 %v254_v5  ;;  %v249_v14 = vadd.f32 1.0, %v248_v53  ;;  %v241_v51 = vmul.f32 %v795_v25, %v240_v57  ;;  %v257_v6 = vmul.f32 -0.5, %v546_v31 }
  0x50   :  { %v226_v37 = vsel %vm225_vm11, %v223_v42, %v220_v20  ;;  %vm243_vm13 = vcmp.lt.f32.partialorder %v242_v60, 0.0004427343  ;;  %v251_v8 = vand.u32 2147483647, %v800_v18  ;;  %v52_v45 = vmax.f32 %v718_v48, 0.0 }
  0x51   :  { %v274_v61 = vadd.f32 %v226_v37, %v50_v38  ;;  %v250_v12 = vmul.f32 %v800_v18, %v249_v14  ;;  %v258_v13 = vadd.f32 1.0, %v257_v6  ;;  %v260_v15 = vand.u32 2147483647, %v546_v31 }
  0x52   :  { %v550_v49 = vpop.eup %549  ;;  %vm252_vm14 = vcmp.lt.f32.partialorder %v251_v8, 0.0004427343  ;;  %v53_v25 = vmax.f32 %v730_v59, 0.0  ;;  %v54_v48 = vmax.f32 %v751_v19, 0.0 }
  0x53   :  { %286 = vxpose.xlu0.b32.cont [8/16] %v270_v16, 128  ;;  %v229_v55 = vmul.f32 0.6931472, %v550_v49  ;;  %v259_v0 = vmul.f32 %v546_v31, %v258_v13  ;;  %vm261_vm15 = vcmp.lt.f32.partialorder %v260_v15, 0.0004427343 }
  0x54   :  { %v552_v58 = vpop.eup %551 }
  0x55   :  { %v235_v43 = vsel %vm234_vm12, %v232_v56, %v229_v55  ;;  %v238_v63 = vmul.f32 0.6931472, %v552_v58 }
  0x56   :  { %v554_v26 = vpop.eup %553  ;;  %v275_v4 = vadd.f32 %v235_v43, %v51_v62 }
  0x57   :  { %287 = vxpose.xlu0.b32.cont [9/16] %v271_v27, 128  ;;  %v244_v9 = vsel %vm243_vm13, %v241_v51, %v238_v63  ;;  %v247_v10 = vmul.f32 0.6931472, %v554_v26 }
  0x58   :  { %v276_v39 = vadd.f32 %v244_v9, %v52_v45 }
  0x59   :  { %v556_v32 = vpop.eup %555  ;;  %v253_v16 = vsel %vm252_vm14, %v250_v12, %v247_v10 }
  0x5a   :  { %v256_v17 = vmul.f32 0.6931472, %v556_v32  ;;  %v277_v1 = vadd.f32 %v253_v16, %v53_v25 }
  0x5b   :  { %288 = vxpose.xlu0.b32.cont [10/16] %v272_v41, 128 }
  0x5c   :  { %v262_v21 = vsel %vm261_vm15, %v259_v0, %v256_v17 }
  0x5d   :  { %v278_v22 = vadd.f32 %v262_v21, %v54_v48 }
  0x5f   :  { %289 = vxpose.xlu0.b32.cont [11/16] %v273_v52, 128 }
  0x63   :  { %290 = vxpose.xlu0.b32.cont [12/16] %v274_v61, 128 }
  0x67   :  { %291 = vxpose.xlu0.b32.cont [13/16] %v275_v4, 128 }
  0x6b   :  { %292 = vxpose.xlu0.b32.cont [14/16] %v276_v39, 128 }
  0x6f   :  { %293 = vxpose.xlu0.b32.cont [15/16] %v277_v1, 128 }
  0x73   :  { %294 = vxpose.xlu0.b32.end [16/16] %v278_v22, 128 }
  0xb7   :  { %v295_v18 = vpop.trf.xlu0 }
  0xbb   :  { %v296_v23 = vpop.trf.xlu0 }
  0xbc   :  { %v443_v7 = vpack.c.bf16 %v296_v23, %v295_v18 }
  0xbe   :  { %444 = vst [vmem:[#allocation5] sm:$0xff] %v443_v7  }
  0xbf   :  { %v297_v24 = vpop.trf.xlu0 }
  0xc3   :  { %v298_v29 = vpop.trf.xlu0 }
  0xc4   :  { %v448_v54 = vpack.c.bf16 %v298_v29, %v297_v24 }
  0xc6   :  { %480 = vst [vmem:[#allocation5 + $0x8] sm:$0xff] %v448_v54  }
  0xc7   :  { %v299_v59 = vpop.trf.xlu0 }
  0xcb   :  { %v300_v27 = vpop.trf.xlu0 }
  0xcc   :  { %v453_v28 = vpack.c.bf16 %v300_v27, %v299_v59 }
  0xce   :  { %481 = vst [vmem:[#allocation5 + $0x10] sm:$0xff] %v453_v28  }
  0xcf   :  { %v301_v30 = vpop.trf.xlu0 }
  0xd3   :  { %v302_v31 = vpop.trf.xlu0 }
  0xd4   :  { %v458_v3 = vpack.c.bf16 %v302_v31, %v301_v30 }
  0xd6   :  { %482 = vst [vmem:[#allocation5 + $0x18] sm:$0xff] %v458_v3  }
  0xd7   :  { %v303_v19 = vpop.trf.xlu0 }
  0xdb   :  { %v304_v34 = vpop.trf.xlu0 }
  0xdc   :  { %v463_v35 = vpack.c.bf16 %v304_v34, %v303_v19 }
  0xde   :  { %483 = vst [vmem:[#allocation5 + $0x20] sm:$0xff] %v463_v35  }
  0xdf   :  { %v305_v36 = vpop.trf.xlu0 }
  0xe3   :  { %v306_v2 = vpop.trf.xlu0 }
  0xe4   :  { %v468_v11 = vpack.c.bf16 %v306_v2, %v305_v36 }
  0xe6   :  { %484 = vst [vmem:[#allocation5 + $0x28] sm:$0xff] %v468_v11  }
  0xe7   :  { %v307_v33 = vpop.trf.xlu0 }
  0xeb   :  { %v308_v40 = vpop.trf.xlu0 }
  0xec   :  { %v473_v41 = vpack.c.bf16 %v308_v40, %v307_v33 }
  0xee   :  { %485 = vst [vmem:[#allocation5 + $0x30] sm:$0xff] %v473_v41  }
  0xef   :  { %v309_v42 = vpop.trf.xlu0 }
  0xf3   :  { %v310_v5 = vpop.trf.xlu0 }
  0xf4   :  { %v478_v44 = vpack.c.bf16 %v310_v5, %v309_v42 }
  0xf6   :  { %486 = vst [vmem:[#allocation5 + $0x38] sm:$0xff] %v478_v44  }
  0xf7   :  { %590 = shalt.err (!%p587_p12)
}
  0xf8   :  { %s591_s24 = scalar_lea.hbm %s848_s1, 1024 }
  0xf9   :  { %p592_p13 = scmp.ne.s32.totalorder %s848_s1, %s591_s24  ;;  %p595_p0 = scmp.lt.u32.totalorder %s591_s24, %s848_s1 }
  0xfb   :  { %p597_p1 = pnand %p595_p0, %p592_p13 }
  0xfd   :  { %600 = shalt.err (!%p597_p1)
}
  0xfe   :  { %s609_s29 = smov 64   ;;  %s610_s30 = smov 4  }
  0xff   :  { %402 = dma.vmem_to_hbm [thread:$0]  %s397_s20, 1024, %s848_s1, [#allocation4], %s609_s29, %s609_s29, %s610_s30  }
 0x100   :  { %603 = dma.done.wait [#allocation4], 1024  }
 0x101   :  { %604 = vsyncadd [#allocation4], 4294966272 }
 0x102   :  { %406 = vsyncpa [#allocation3], 1 }
 0x103   :  { %407 = vsyncpa [#allocation4], 1 }

</bundles_post_ra>
